<compile_context>
chip_gen: v7x
topology: tpu7x:2x2x1
jax: 0.10.0
libtpu: 0.0.40
codegen_flags: <defaults>
</compile_context>

<pallas_src>
import jax
import jax.numpy as jnp
from jax.experimental import pallas as pl
from jax.experimental.pallas import tpu as pltpu

_EPS = 1e-5


def _fused_kernel(a_ref, v_ref, w1_ref, w2_ref, b_ref, out_ref):
    # a_ref: [B,T,Da] f32, v_ref: [B,T,Dv] f32
    # w1_ref: [Da+Dv, 1024] bf16 (block-diag, BN and 1/T folded in)
    # w2_ref: [1024, Cpad]  bf16 (collapsed output chain)
    # b_ref : [1, 1024+Cpad] f32 (packed biases)
    h_dim = w1_ref.shape[1]

    # ---- time reduction (sum; the 1/T factor lives in w1) ----
    a_sum = jnp.sum(a_ref[...].astype(jnp.float32), axis=1)      # [B, Da]
    v_sum = jnp.sum(v_ref[...].astype(jnp.float32), axis=1)      # [B, Dv]
    x = jnp.concatenate([a_sum, v_sum], axis=-1)                 # [B, Da+Dv]

    b1 = b_ref[:, :h_dim]                                        # [1, 1024]
    b2 = b_ref[:, h_dim:]                                        # [1, Cpad]

    # ---- fused Linear+BN+mean (one matmul) -> ReLU ----
    h = jnp.dot(x.astype(jnp.bfloat16), w1_ref[...],
                preferred_element_type=jnp.float32) + b1          # [B, 1024]
    h = jnp.maximum(h, 0.0)                                       # ReLU (Dropout = id)

    # ---- collapsed output chain (one matmul) ----
    out = jnp.dot(h.astype(jnp.bfloat16), w2_ref[...],
                  preferred_element_type=jnp.float32) + b2        # [B, Cpad]
    out_ref[...] = out.astype(out_ref.dtype)


def devide_time_mean_forward(audio_feat, video_feat, folded_params, num_classes):
    w1, w2, b_packed = folded_params
    B = audio_feat.shape[0]
    c_pad = w2.shape[1]
    vmem = pl.BlockSpec(memory_space=pltpu.MemorySpace.VMEM)
    out = pl.pallas_call(
        _fused_kernel,
        out_shape=jax.ShapeDtypeStruct((B, c_pad), jnp.float32),
        in_specs=[vmem] * 5,
        out_specs=vmem,
    )(audio_feat, video_feat, w1, w2, b_packed)
    return out[:, :num_classes]


def init_raw_params(key, audio_emb_dim, video_emb_dim, num_classes):
    """PyTorch-equivalent parameters (Linear weights stored as [in, out])."""
    ks = jax.random.split(key, 8)

    def lin(k, din, dout, scale=0.02):
        kw, kb = jax.random.split(k)
        w = jax.random.normal(kw, (din, dout), jnp.float32) * scale
        b = jax.random.normal(kb, (1, dout), jnp.float32) * scale
        return w, b

    def bn(k, dim):
        k1, k2, k3, k4 = jax.random.split(k, 4)
        gamma = 1.0 + 0.1 * jax.random.normal(k1, (1, dim), jnp.float32)
        beta = 0.1 * jax.random.normal(k2, (1, dim), jnp.float32)
        mean = 0.1 * jax.random.normal(k3, (1, dim), jnp.float32)
        var = jax.random.uniform(k4, (1, dim), jnp.float32, minval=0.5, maxval=1.5)
        return gamma, beta, mean, var

    aw1, ab1 = lin(ks[0], audio_emb_dim, 512)
    a_gamma, a_beta, a_mean, a_var = bn(ks[1], 512)
    aw2, ab2 = lin(ks[2], 512, 128)
    vw1, vb1 = lin(ks[3], video_emb_dim, 512)
    v_gamma, v_beta, v_mean, v_var = bn(ks[4], 512)
    vw2, vb2 = lin(ks[5], 512, 128)
    ow1, ob1 = lin(ks[6], 256, 128)
    ow2, ob2 = lin(ks[7], 128, num_classes)
    return (aw1, ab1, a_gamma, a_beta, a_mean, a_var,
            vw1, vb1, v_gamma, v_beta, v_mean, v_var,
            aw2, ab2, vw2, vb2, ow1, ob1, ow2, ob2)


def fold_params(raw, T, num_classes):
    """Init-time algebraic folding -> (w1 bf16, w2 bf16, packed bias f32)."""
    (aw1, ab1, a_gamma, a_beta, a_mean, a_var,
     vw1, vb1, v_gamma, v_beta, v_mean, v_var,
     aw2, ab2, vw2, vb2, ow1, ob1, ow2, ob2) = raw

    def fold_first(w1, b1, gamma, beta, mean, var):
        scale = gamma / jnp.sqrt(var + _EPS)          # [1, 512]
        shift = beta - mean * scale
        w = (w1 * scale) / float(T)                   # BN scale + 1/T folded
        b = b1 * scale + shift
        return w, b

    w1a, b1a = fold_first(aw1, ab1, a_gamma, a_beta, a_mean, a_var)
    w1v, b1v = fold_first(vw1, vb1, v_gamma, v_beta, v_mean, v_var)
    da, dv = w1a.shape[0], w1v.shape[0]
    h = w1a.shape[1]                                  # 512

    # Block-diagonal packed first layer: [(Da+Dv), 2H]
    w1 = jnp.zeros((da + dv, 2 * h), jnp.float32)
    w1 = w1.at[:da, :h].set(w1a).at[da:, h:].set(w1v)
    b1 = jnp.concatenate([b1a, b1v], axis=-1)         # [1, 2H]

    # Collapse the activation-free tail (Linear->Linear->Linear) per branch.
    ow1a, ow1v = ow1[:128], ow1[128:]                 # audio-first concat order
    wa = aw2 @ ow1a @ ow2                             # [512, C]
    wv = vw2 @ ow1v @ ow2                             # [512, C]
    b_out = ab2 @ ow1a @ ow2 + vb2 @ ow1v @ ow2 + ob1 @ ow2 + ob2   # [1, C]
    w2 = jnp.concatenate([wa, wv], axis=0)            # [2H, C]

    # Pad class dim to a lane-dense multiple of 128 (unmasked stores).
    c_pad = max(128, ((num_classes + 127) // 128) * 128)
    w2p = jnp.zeros((2 * h, c_pad), jnp.float32).at[:, :num_classes].set(w2)
    b2p = jnp.zeros((1, c_pad), jnp.float32).at[:, :num_classes].set(b_out)

    b_packed = jnp.concatenate([b1, b2p], axis=-1)    # [1, 2H + Cpad] f32
    return w1.astype(jnp.bfloat16), w2p.astype(jnp.bfloat16), b_packed


def reference_forward(audio_feat, video_feat, raw):
    """Pure-JAX f32 reference of the ORIGINAL (unfolded) architecture."""
    (aw1, ab1, a_gamma, a_beta, a_mean, a_var,
     vw1, vb1, v_gamma, v_beta, v_mean, v_var,
     aw2, ab2, vw2, vb2, ow1, ob1, ow2, ob2) = raw

    def embed(x, w1, b1, gamma, beta, mean, var, w2, b2):
        z = x @ w1 + b1
        z = (z - mean) / jnp.sqrt(var + _EPS) * gamma + beta   # BN eval
        z = jnp.maximum(z, 0.0)                                # ReLU (Dropout=id)
        return z @ w2 + b2

    a = jnp.mean(audio_feat, axis=1)
    v = jnp.mean(video_feat, axis=1)
    ea = embed(a, aw1, ab1, a_gamma, a_beta, a_mean, a_var, aw2, ab2)
    ev = embed(v, vw1, vb1, v_gamma, v_beta, v_mean, v_var, vw2, vb2)
    emb = jnp.concatenate([ea, ev], axis=-1)
    return (emb @ ow1 + ob1) @ ow2 + ob2


if __name__ == "__main__":
    B, T = 4, 24
    audio_emb_dim, video_emb_dim, num_classes = 32, 48, 10

    key = jax.random.PRNGKey(0)
    k_a, k_v, k_p = jax.random.split(key, 3)
    audio_feat = jax.random.normal(k_a, (B, T, audio_emb_dim), jnp.float32)
    video_feat = jax.random.normal(k_v, (B, T, video_emb_dim), jnp.float32)

    raw_params = init_raw_params(k_p, audio_emb_dim, video_emb_dim, num_classes)
    folded = fold_params(raw_params, T, num_classes)

    out = devide_time_mean_forward(audio_feat, video_feat, folded, num_classes)
    out = jax.block_until_ready(out)

    ref = reference_forward(audio_feat, video_feat, raw_params)
    assert out.shape == (B, num_classes)
    max_err = float(jnp.max(jnp.abs(out - ref)))
    assert jnp.allclose(out, ref, atol=1e-3, rtol=1e-2), \
        f"mismatch vs reference, max abs err {max_err}"

    print("KERNEL_OK")
</pallas_src>

<mosaic_0001>
module attributes {stable_mosaic.version = 11 : i64} {
  func.func @_fused_kernel(%arg0: memref<4x24x32xf32, #tpu.memory_space<vmem>>, %arg1: memref<4x24x48xf32, #tpu.memory_space<vmem>>, %arg2: memref<80x1024xbf16, #tpu.memory_space<vmem>>, %arg3: memref<1024x128xbf16, #tpu.memory_space<vmem>>, %arg4: memref<1x1152xf32, #tpu.memory_space<vmem>>, %arg5: memref<4x128xf32, #tpu.memory_space<vmem>>) attributes {dimension_semantics = [], scalar_prefetch = 0 : i64, scratch_operands = 0 : i64, tpu.core_type = #tpu.core_type<tc>} {
    %c0 = arith.constant 0 : index
    %c0_0 = arith.constant 0 : index
    %c0_1 = arith.constant 0 : index
    %0 = vector.load %arg0[%c0, %c0_0, %c0_1] : memref<4x24x32xf32, #tpu.memory_space<vmem>>, vector<4x24x32xf32>
    %cst = arith.constant dense<0.000000e+00> : vector<4x32xf32>
    %1 = vector.multi_reduction <add>, %0, %cst [1] : vector<4x24x32xf32> to vector<4x32xf32>
    %c0_2 = arith.constant 0 : index
    %c0_3 = arith.constant 0 : index
    %c0_4 = arith.constant 0 : index
    %2 = vector.load %arg1[%c0_2, %c0_3, %c0_4] : memref<4x24x48xf32, #tpu.memory_space<vmem>>, vector<4x24x48xf32>
    %cst_5 = arith.constant dense<0.000000e+00> : vector<4x48xf32>
    %3 = vector.multi_reduction <add>, %2, %cst_5 [1] : vector<4x24x48xf32> to vector<4x48xf32>
    %4 = tpu.concatenate %1, %3 in 1 : vector<4x32xf32>, vector<4x48xf32> -> vector<4x80xf32>
    %c0_6 = arith.constant 0 : index
    %c0_7 = arith.constant 0 : index
    %5 = vector.load %arg4[%c0_6, %c0_7] : memref<1x1152xf32, #tpu.memory_space<vmem>>, vector<1x1024xf32>
    %c0_8 = arith.constant 0 : index
    %c1024 = arith.constant 1024 : index
    %6 = vector.load %arg4[%c0_8, %c1024] : memref<1x1152xf32, #tpu.memory_space<vmem>>, vector<1x128xf32>
    %7 = arith.truncf %4 : vector<4x80xf32> to vector<4x80xbf16>
    %c0_9 = arith.constant 0 : index
    %c0_10 = arith.constant 0 : index
    %8 = vector.load %arg2[%c0_9, %c0_10] : memref<80x1024xbf16, #tpu.memory_space<vmem>>, vector<80x1024xbf16>
    %cst_11 = arith.constant dense<0.000000e+00> : vector<4x1024xf32>
    %9 = tpu.matmul %7, %8, %cst_11 {dimension_numbers = #tpu.dot_dimension_numbers<[1], [0], [0], [1], [0, 0, 1, 1], [], []>} : vector<4x80xbf16>, vector<80x1024xbf16>, vector<4x1024xf32> -> vector<4x1024xf32>
    %10 = vector.broadcast %5 : vector<1x1024xf32> to vector<4x1024xf32>
    %11 = arith.addf %9, %10 : vector<4x1024xf32>
    %cst_12 = arith.constant 0.000000e+00 : f32
    %12 = vector.broadcast %cst_12 : f32 to vector<4x1024xf32>
    %13 = arith.maximumf %11, %12 : vector<4x1024xf32>
    %14 = arith.truncf %13 : vector<4x1024xf32> to vector<4x1024xbf16>
    %c0_13 = arith.constant 0 : index
    %c0_14 = arith.constant 0 : index
    %15 = vector.load %arg3[%c0_13, %c0_14] : memref<1024x128xbf16, #tpu.memory_space<vmem>>, vector<1024x128xbf16>
    %cst_15 = arith.constant dense<0.000000e+00> : vector<4x128xf32>
    %16 = tpu.matmul %14, %15, %cst_15 {dimension_numbers = #tpu.dot_dimension_numbers<[1], [0], [0], [1], [0, 0, 1, 1], [], []>} : vector<4x1024xbf16>, vector<1024x128xbf16>, vector<4x128xf32> -> vector<4x128xf32>
    %17 = vector.broadcast %6 : vector<1x128xf32> to vector<4x128xf32>
    %18 = arith.addf %16, %17 : vector<4x128xf32>
    %c0_16 = arith.constant 0 : index
    %c0_17 = arith.constant 0 : index
    %19 = vector.load %arg5[%c0_16, %c0_17] : memref<4x128xf32, #tpu.memory_space<vmem>>, vector<4x128xf32>
    tpu.vector_store %arg5[%c0_16, %c0_17], %18 {strides = array<i32>} : memref<4x128xf32, #tpu.memory_space<vmem>>, vector<4x128xf32>,
    return
  }
}

</mosaic_0001>

<bundles_post_ra>
// kernel: tpu_custom_call.1
= control target key start
LH: loop header
LB: loop body
LE: loop exit
PB: predicated region body
PF: predicated region fallthrough
CT: control target
= control target key end

     0   :  { %10 = vsyncpa [#allocation3], 0  ;;  %s2000_s0 = inlined_call_operand.hbm [shape: f32[4,24,32], index: 0, kind: input, shape index: {}]   ;;  %s2001_s1 = inlined_call_operand.hbm [shape: f32[4,24,48], index: 1, kind: input, shape index: {}]   ;;  %s2002_s2 = inlined_call_operand.hbm [shape: bf16[80,1024], index: 2, kind: input, shape index: {}]   ;;  %s2003_s3 = inlined_call_operand.hbm [shape: bf16[1024,128], index: 3, kind: input, shape index: {}]   ;;  %s2004_s4 = inlined_call_operand.vmem [shape: f32[1,1152], index: 4, kind: input, shape index: {}]   ;;  %s2005_s5 = inlined_call_operand.hbm [shape: f32[4,128], index: 5, kind: output, shape index: {}]  }
   0x1   :  { %11 = vsyncpa [#allocation6], 0 }
   0x2   :  { %12 = vsyncpa [#allocation9], 0 }
   0x3   :  { %13 = vsyncpa [#allocation4], 0  ;;  %s1768_s18 = smov [#allocation5]   ;;  %s1769_s20 = smov [#allocation2]  }
   0x4   :  { %s31_s19 = sshll.u32 %s1768_s18, 4  ;;  %s19_s21 = sshll.u32 %s1769_s20, 4  ;;  %s32_s19 = int_to_ptr.vmem [resolvable:$true] %s31_s19  ;;  %s1810_s21 = int_to_ptr.vmem [resolvable:$true] %s19_s21 }
   0x5   :  { %s1650_s24 = scalar_lea.hbm %s2001_s1, 1536 }
   0x6   :  { %p1651_p0 = scmp.ne.s32.totalorder %s2001_s1, %s1650_s24  ;;  %p1654_p1 = scmp.lt.u32.totalorder %s1650_s24, %s2001_s1 }
   0x8   :  { %p1656_p2 = pnand %p1654_p1, %p1651_p0 }
   0xa   :  { %1659 = shalt.err (!%p1656_p2)
}
   0xb   :  { %s1660_s29 = scalar_lea.vmem %s32_s19, 1536  ;;  %p1665_p4 = scmp.lt.s32.totalorder %s32_s19, %s32_s19 }
   0xc   :  { %p1661_p3 = scmp.ne.s32.totalorder %s32_s19, %s1660_s29  ;;  %p1666_p5 = scmp.lt.s32.totalorder %s1660_s29, %s1660_s29 }
   0xe   :  { %p1667_p6 = por %p1666_p5, %p1665_p4 }
  0x10   :  { %p1668_p7 = pnand %p1667_p6, %p1661_p3 }
  0x12   :  { %1671 = shalt.err (!%p1668_p7)
}
  0x13   :  { %s1770_s30 = smov 128   ;;  %s1771_s6 = smov 8  }
  0x14   :  { %37 = dma.hbm_to_vmem [thread:$0]  %s2001_s1, 1536, %s32_s19, [#allocation6], %s1770_s30, %s1770_s30, %s1771_s6  }
  0x15   :  { %s1672_s11 = scalar_lea.hbm %s2000_s0, 1536 }
  0x16   :  { %p1673_p8 = scmp.ne.s32.totalorder %s2000_s0, %s1672_s11  ;;  %p1676_p9 = scmp.lt.u32.totalorder %s1672_s11, %s2000_s0 }
  0x18   :  { %p1678_p10 = pnand %p1676_p9, %p1673_p8 }
  0x1a   :  { %1681 = shalt.err (!%p1678_p10)
}
  0x1b   :  { %s1682_s16 = scalar_lea.vmem %s1810_s21, 1536  ;;  %p1687_p12 = scmp.lt.s32.totalorder %s1810_s21, %s1810_s21 }
  0x1c   :  { %p1683_p11 = scmp.ne.s32.totalorder %s1810_s21, %s1682_s16  ;;  %p1688_p13 = scmp.lt.s32.totalorder %s1682_s16, %s1682_s16 }
  0x1e   :  { %p1689_p0 = por %p1688_p13, %p1687_p12 }
  0x20   :  { %p1690_p1 = pnand %p1689_p0, %p1683_p11 }
  0x22   :  { %1693 = shalt.err (!%p1690_p1)
}
  0x23   :  { %25 = dma.hbm_to_vmem [thread:$0]  %s2000_s0, 1536, %s1810_s21, [#allocation3], %s1770_s30, %s1770_s30, %s1771_s6  }
  0x24   :  { %s1772_s18 = smov [#allocation7]   ;;  %s1694_s23 = scalar_lea.hbm %s2002_s2, 5120 }
  0x25   :  { %s43_s19 = sshll.u32 %s1772_s18, 4  ;;  %p1695_p2 = scmp.ne.s32.totalorder %s2002_s2, %s1694_s23  ;;  %s44_s19 = int_to_ptr.vmem [resolvable:$true] %s43_s19 }
  0x26   :  { %p1698_p3 = scmp.lt.u32.totalorder %s1694_s23, %s2002_s2 }
  0x28   :  { %p1700_p4 = pnand %p1698_p3, %p1695_p2 }
  0x2a   :  { %1703 = shalt.err (!%p1700_p4)
}
  0x2b   :  { %s1704_s28 = scalar_lea.vmem %s44_s19, 5120  ;;  %p1709_p6 = scmp.lt.s32.totalorder %s44_s19, %s44_s19 }
  0x2c   :  { %p1705_p5 = scmp.ne.s32.totalorder %s44_s19, %s1704_s28  ;;  %p1710_p7 = scmp.lt.s32.totalorder %s1704_s28, %s1704_s28 }
  0x2e   :  { %p1711_p8 = por %p1710_p7, %p1709_p6 }
  0x30   :  { %p1712_p9 = pnand %p1711_p8, %p1705_p5 }
  0x32   :  { %1715 = shalt.err (!%p1712_p9)
}
  0x33   :  { %s1773_s0 = smov 512   ;;  %s1774_s21 = smov 32  }
  0x34   :  { %49 = dma.hbm_to_vmem [thread:$0]  %s2002_s2, 5120, %s44_s19, [#allocation6], %s1773_s0, %s1773_s0, %s1774_s21  }
  0x35   :  { %s1775_s6 = smov [#allocation8]   ;;  %s1716_s10 = scalar_lea.hbm %s2003_s3, 8192 }
  0x36   :  { %s55_s7 = sshll.u32 %s1775_s6, 4  ;;  %p1717_p10 = scmp.ne.s32.totalorder %s2003_s3, %s1716_s10  ;;  %s56_s7 = int_to_ptr.vmem [resolvable:$true] %s55_s7 }
  0x37   :  { %p1720_p11 = scmp.lt.u32.totalorder %s1716_s10, %s2003_s3 }
  0x39   :  { %p1722_p12 = pnand %p1720_p11, %p1717_p10 }
  0x3b   :  { %1725 = shalt.err (!%p1722_p12)
}
  0x3c   :  { %s1726_s15 = scalar_lea.vmem %s56_s7, 8192  ;;  %p1731_p0 = scmp.lt.s32.totalorder %s56_s7, %s56_s7 }
  0x3d   :  { %p1727_p13 = scmp.ne.s32.totalorder %s56_s7, %s1726_s15  ;;  %p1732_p1 = scmp.lt.s32.totalorder %s1726_s15, %s1726_s15 }
  0x3f   :  { %p1733_p2 = por %p1732_p1, %p1731_p0 }
  0x41   :  { %p1734_p3 = pnand %p1733_p2, %p1727_p13 }
  0x43   :  { %1737 = shalt.err (!%p1734_p3)
}
  0x44   :  { %s1776_s2 = smov 64   ;;  %s1777_s16 = smov 4  }
  0x45   :  { %61 = dma.hbm_to_vmem [thread:$0]  %s2003_s3, 8192, %s56_s7, [#allocation9], %s1776_s2, %s1776_s2, %s1777_s16  }
  0x46   :  { %1760 = dma.done.wait [#allocation3], 1536  }
  0x47   :  { %1761 = vsyncadd [#allocation3], 4294965760 }
  0x48   :  { %1762 = dma.done.wait [#allocation6], 6656  }
  0x49   :  { %1763 = vsyncadd [#allocation6], 4294960640 }
  0x4a   :  { %1764 = dma.done.wait [#allocation9], 8192  }
  0x4b   :  { %1765 = vsyncadd [#allocation9], 4294959104  ;;  %vm146_vm0 = vcmask 392192   ;;  %v134_v0 = vld [vmem:[#allocation5] sm:$0xff]  ;;  %v135_v1 = vld [vmem:[#allocation5 + $0x8] sm:$0xff]  ;;  %vm89_vm1 = vcmask 261120  }
  0x4c   :  { %v136_v2 = vld [vmem:[#allocation5 + $0x10] sm:$0xff]  ;;  %v137_v3 = vld [vmem:[#allocation5 + $0x18] sm:$0xff]  ;;  %v138_v4 = vld [vmem:[#allocation5 + $0x20] sm:$0xff]  ;;  %v147_v6 = vsel %vm146_vm0, %v134_v0, 0.0  ;;  %v148_v7 = vsel %vm146_vm0, %v135_v1, 0.0  ;;  %vm195_vm2 = vcmask 1041409  }
  0x4d   :  { %v139_v5 = vld [vmem:[#allocation5 + $0x28] sm:$0xff]  ;;  %v150_v8 = vsel %vm146_vm0, %v136_v2, 0.0  ;;  %v140_v9 = vld [vmem:[#allocation5 + $0x30] sm:$0xff]  ;;  %v141_v10 = vld [vmem:[#allocation5 + $0x38] sm:$0xff]  ;;  %v149_v12 = vadd.f32 %v148_v7, %v147_v6  ;;  %v158_v13 = vsel %vm146_vm0, %v137_v3, 0.0  ;;  %v159_v14 = vsel %vm146_vm0, %v138_v4, 0.0 }
  0x4e   :  { %v142_v11 = vld [vmem:[#allocation5 + $0x40] sm:$0xff]  ;;  %v161_v15 = vsel %vm146_vm0, %v139_v5, 0.0  ;;  %v143_v16 = vld [vmem:[#allocation5 + $0x48] sm:$0xff]  ;;  %v144_v17 = vld [vmem:[#allocation5 + $0x50] sm:$0xff]  ;;  %v160_v19 = vadd.f32 %v159_v14, %v158_v13  ;;  %v169_v20 = vsel %vm146_vm0, %v140_v9, 0.0  ;;  %v170_v21 = vsel %vm146_vm0, %v141_v10, 0.0 }
  0x4f   :  { %v145_v18 = vld [vmem:[#allocation5 + $0x58] sm:$0xff]  ;;  %v172_v22 = vsel %vm146_vm0, %v142_v11, 0.0  ;;  %v151_v23 = vadd.f32 %v150_v8, %v149_v12  ;;  %v171_v24 = vadd.f32 %v170_v21, %v169_v20  ;;  %v180_v25 = vsel %vm146_vm0, %v143_v16, 0.0  ;;  %v216_v27 = vld [vmem:[#allocation7] sm:$0xff]  ;;  %v217_v29 = vld [vmem:[#allocation7 + $0x8] sm:$0xff] }
  0x50   :  { %v181_v26 = vsel %vm146_vm0, %v144_v17, 0.0  ;;  %v220_v28 = vld [vmem:[#allocation7 + $0x20] sm:$0xff]  ;;  %v162_v30 = vadd.f32 %v161_v15, %v160_v19  ;;  %v183_v32 = vsel %vm146_vm0, %v145_v18, 0.0  ;;  %v221_v34 = vld [vmem:[#allocation7 + $0x28] sm:$0xff]  ;;  %vm197_vm3 = vcmask 1042434   ;;  %v79_v17 = vld [vmem:[#allocation2 + $0x10] sm:$0xff] }
  0x51   :  { %v182_v31 = vadd.f32 %v181_v26, %v180_v25  ;;  %v1378_v33 = vcombine.high %v216_v27, %v220_v28  ;;  %v224_v35 = vld [vmem:[#allocation7 + $0x40] sm:$0xff]  ;;  %v152_v37 = vrot.slane %v151_v23, 4  ;;  %v173_v38 = vadd.f32 %v172_v22, %v171_v24  ;;  %v225_v41 = vld [vmem:[#allocation7 + $0x48] sm:$0xff]  ;;  %v80_v22 = vld [vmem:[#allocation2 + $0x18] sm:$0xff] }
  0x52   :  { %v228_v36 = vld [vmem:[#allocation7 + $0x60] sm:$0xff]  ;;  %v1380_v39 = vcombine.high %v217_v29, %v221_v34  ;;  %v1377_v40 = vcombine.low %v216_v27, %v220_v28  ;;  %v229_v42 = vld [vmem:[#allocation7 + $0x68] sm:$0xff]  ;;  %v163_v44 = vrot.slane %v162_v30, 4  ;;  %v1379_v46 = vcombine.low %v217_v29, %v221_v34 }
  0x53   :  { %v1878_v43 = vld [vmem:[#allocation7 + $0x80] sm:$0xff]  ;;  %v184_v45 = vadd.f32 %v183_v32, %v182_v31  ;;  %501 = vmatprep.subr.bf16.mxu0 %v1378_v33  ;;  %v1386_v47 = vcombine.high %v224_v35, %v228_v36  ;;  %v1882_v49 = vld [vmem:[#allocation7 + $0x88] sm:$0xff]  ;;  %v153_v51 = vadd.f32 %v152_v37, %v151_v23  ;;  %v174_v52 = vrot.slane %v173_v38, 4  ;;  %v83_v31 = vld [vmem:[#allocation2 + $0x30] sm:$0xff] }
  0x54   :  { %v1880_v48 = vld [vmem:[#allocation7 + $0xa0] sm:$0xff]  ;;  %v1884_v50 = vld [vmem:[#allocation7 + $0xa8] sm:$0xff]  ;;  %542 = vmatprep.subr.bf16.mxu1 %v1380_v39  ;;  %502 = vmatpush1.bf16.msra.mxu0 %v1377_v40  ;;  %v1388_v53 = vcombine.high %v225_v41, %v229_v42  ;;  %v1385_v54 = vcombine.low %v224_v35, %v228_v36  ;;  %v164_v57 = vadd.f32 %v163_v44, %v162_v30  ;;  %vm199_vm4 = vcmask 1043459   ;;  %v84_v36 = vld [vmem:[#allocation2 + $0x38] sm:$0xff] }
  0x55   :  { %v1886_v55 = vld [vmem:[#allocation7 + $0xc0] sm:$0xff]  ;;  %v185_v58 = vrot.slane %v184_v45, 4  ;;  %543 = vmatpush1.bf16.msra.mxu1 %v1379_v46  ;;  %503 = vmatprep.subr.bf16.mxu0 %v1386_v47  ;;  %v1387_v59 = vcombine.low %v225_v41, %v229_v42  ;;  %v1394_v60 = vcombine.high %v1878_v43, %v1880_v48  ;;  %v1892_v61 = vld [vmem:[#allocation7 + $0xc8] sm:$0xff]  ;;  %v154_v63 = vrot.slane %v153_v51, 2  ;;  %v88_v47 = vld [vmem:[#allocation2 + $0x58] sm:$0xff] }
  0x56   :  { %v1888_v56 = vld [vmem:[#allocation7 + $0xe0] sm:$0xff]  ;;  %v1894_v62 = vld [vmem:[#allocation7 + $0xe8] sm:$0xff]  ;;  %v175_v0 = vadd.f32 %v174_v52, %v173_v38  ;;  %544 = vmatprep.subr.bf16.mxu1 %v1388_v53  ;;  %v1396_v1 = vcombine.high %v1882_v49, %v1884_v50  ;;  %v1393_v2 = vcombine.low %v1878_v43, %v1880_v48  ;;  %v165_v5 = vrot.slane %v164_v57, 2  ;;  %v87_v43 = vld [vmem:[#allocation2 + $0x50] sm:$0xff] }
  0x57   :  { %v1900_v3 = vld [vmem:[#allocation7 + $0x100] sm:$0xff]  ;;  %v186_v6 = vadd.f32 %v185_v58, %v184_v45  ;;  %v1395_v7 = vcombine.low %v1882_v49, %v1884_v50  ;;  %v1402_v8 = vcombine.high %v1886_v55, %v1888_v56  ;;  %v1908_v9 = vld [vmem:[#allocation7 + $0x108] sm:$0xff]  ;;  %v155_v12 = vadd.f32 %v154_v63, %v153_v51  ;;  %v1929_v51 = vld [vmem:[#allocation7 + $0x10] sm:$0xff] }
  0x58   :  { %v1902_v4 = vld [vmem:[#allocation7 + $0x120] sm:$0xff]  ;;  %v1910_v10 = vld [vmem:[#allocation7 + $0x128] sm:$0xff]  ;;  %v176_v13 = vrot.slane %v175_v0, 2  ;;  %504 = vmatpush1.bf16.msra.mxu0 %v1385_v54  ;;  %v1404_v14 = vcombine.high %v1892_v61, %v1894_v62  ;;  %v1401_v15 = vcombine.low %v1886_v55, %v1888_v56  ;;  %v166_v18 = vadd.f32 %v165_v5, %v164_v57 }
  0x59   :  { %v77_v11 = vld [vmem:[#allocation2] sm:$0xff]  ;;  %v78_v16 = vld [vmem:[#allocation2 + $0x8] sm:$0xff]  ;;  %v187_v19 = vrot.slane %v186_v6, 2  ;;  %545 = vmatpush1.bf16.msra.mxu1 %v1387_v59  ;;  %505 = vmatprep.subr.bf16.mxu0 %v1394_v60  ;;  %v1403_v20 = vcombine.low %v1892_v61, %v1894_v62  ;;  %v1410_v21 = vcombine.high %v1900_v3, %v1902_v4  ;;  %v156_v23 = vrot.slane %v155_v12, 1  ;;  %v1935_v60 = vld [vmem:[#allocation7 + $0x30] sm:$0xff] }
  0x5a   :  { %v177_v24 = vadd.f32 %v176_v13, %v175_v0  ;;  %546 = vmatprep.subr.bf16.mxu1 %v1396_v1  ;;  %v1412_v25 = vcombine.high %v1908_v9, %v1910_v10  ;;  %v81_v26 = vld [vmem:[#allocation2 + $0x20] sm:$0xff]  ;;  %v82_v27 = vld [vmem:[#allocation2 + $0x28] sm:$0xff]  ;;  %v90_v28 = vsel %vm89_vm1, %v77_v11, 0.0  ;;  %v167_v29 = vrot.slane %v166_v18, 1  ;;  %v1941_v1 = vld [vmem:[#allocation7 + $0x18] sm:$0xff] }
  0x5b   :  { %v188_v30 = vadd.f32 %v187_v19, %v186_v6  ;;  %v91_v32 = vsel %vm89_vm1, %v78_v16, 0.0  ;;  %v93_v33 = vsel %vm89_vm1, %v79_v17, 0.0  ;;  %v157_v34 = vadd.f32 %v156_v23, %v155_v12  ;;  %v85_v37 = vld [vmem:[#allocation2 + $0x40] sm:$0xff]  ;;  %v86_v42 = vld [vmem:[#allocation2 + $0x48] sm:$0xff] }
  0x5c   :  { %v178_v35 = vrot.slane %v177_v24, 1  ;;  %506 = vmatpush1.bf16.msra.mxu0 %v1393_v2  ;;  %v92_v38 = vadd.f32 %v91_v32, %v90_v28  ;;  %v101_v39 = vsel %vm89_vm1, %v80_v22, 0.0  ;;  %v168_v40 = vadd.f32 %v167_v29, %v166_v18 }
  0x5d   :  { %v189_v41 = vrot.slane %v188_v30, 1  ;;  %547 = vmatpush1.bf16.msra.mxu1 %v1395_v7  ;;  %507 = vmatprep.subr.bf16.mxu0 %v1402_v8  ;;  %v102_v44 = vsel %vm89_vm1, %v81_v26, 0.0  ;;  %v104_v45 = vsel %vm89_vm1, %v82_v27, 0.0  ;;  %v112_v50 = vsel %vm89_vm1, %v83_v31, 0.0  ;;  %v223_v8 = vld [vmem:[#allocation7 + $0x38] sm:$0xff] }
  0x5e   :  { %v179_v46 = vadd.f32 %v178_v35, %v177_v24  ;;  %548 = vmatprep.subr.bf16.mxu1 %v1404_v14  ;;  %v94_v48 = vadd.f32 %v93_v33, %v92_v38  ;;  %v103_v49 = vadd.f32 %v102_v44, %v101_v39  ;;  %v206_v53 = vsel %vm195_vm2, %v168_v40, %v157_v34  ;;  %v226_v39 = vld [vmem:[#allocation7 + $0x50] sm:$0xff] }
  0x5f   :  { %v190_v52 = vadd.f32 %v189_v41, %v188_v30  ;;  %v113_v54 = vsel %vm89_vm1, %v84_v36, 0.0  ;;  %v115_v55 = vsel %vm89_vm1, %v85_v37, 0.0  ;;  %v123_v62 = vsel %vm89_vm1, %v86_v42, 0.0  ;;  %v230_v40 = vld [vmem:[#allocation7 + $0x70] sm:$0xff]  ;;  %v227_v41 = vld [vmem:[#allocation7 + $0x58] sm:$0xff] }
  0x60   :  { %v207_v56 = vsel %vm197_vm3, %v179_v46, %v206_v53  ;;  %508 = vmatpush1.bf16.msra.mxu0 %v1401_v15  ;;  %v95_v57 = vrot.slane %v94_v48, 4  ;;  %v105_v58 = vadd.f32 %v104_v45, %v103_v49  ;;  %v114_v59 = vadd.f32 %v113_v54, %v112_v50  ;;  %v231_v42 = vld [vmem:[#allocation7 + $0x78] sm:$0xff]  ;;  %v238_v49 = vld [vmem:[#allocation7 + $0xb0] sm:$0xff] }
  0x61   :  { %v208_v61 = vsel %vm199_vm4, %v190_v52, %v207_v56  ;;  %549 = vmatpush1.bf16.msra.mxu1 %v1403_v20  ;;  %509 = vmatprep.subr.bf16.mxu0 %v1410_v21  ;;  %v124_v63 = vsel %vm89_vm1, %v87_v43, 0.0  ;;  %v126_v0 = vsel %vm89_vm1, %v88_v47, 0.0  ;;  %v1409_v11 = vcombine.low %v1900_v3, %v1902_v4  ;;  %v235_v50 = vld [vmem:[#allocation7 + $0x98] sm:$0xff]  ;;  %v242_v56 = vld [vmem:[#allocation7 + $0xd0] sm:$0xff] }
  0x62   :  { %209 = vrot.lane.b32.xlu0 %v208_v61, %s1774_s21  ;;  %550 = vmatprep.subr.bf16.mxu1 %v1412_v25  ;;  %v96_v2 = vadd.f32 %v95_v57, %v94_v48  ;;  %v106_v5 = vrot.slane %v105_v58, 4  ;;  %v116_v6 = vadd.f32 %v115_v55, %v114_v59  ;;  %v125_v7 = vadd.f32 %v124_v63, %v123_v62  ;;  %v234_v48 = vld [vmem:[#allocation7 + $0x90] sm:$0xff]  ;;  %v247_v59 = vld [vmem:[#allocation7 + $0xf8] sm:$0xff] }
  0x63   :  { %v1411_v12 = vcombine.low %v1908_v9, %v1910_v10  ;;  %v1381_v13 = vcombine.low %v1929_v51, %v1935_v60  ;;  %v1778_v18 = vmov 0   ;;  %v1382_v19 = vcombine.high %v1929_v51, %v1935_v60  ;;  %v239_v51 = vld [vmem:[#allocation7 + $0xb8] sm:$0xff]  ;;  %v246_v57 = vld [vmem:[#allocation7 + $0xf0] sm:$0xff] }
  0x64   :  { %v97_v14 = vrot.slane %v96_v2, 2  ;;  %v107_v15 = vadd.f32 %v106_v5, %v105_v58  ;;  %v117_v16 = vrot.slane %v116_v6, 4  ;;  %v127_v17 = vadd.f32 %v126_v0, %v125_v7  ;;  %533 = vmatprep.mubr.bf16.mxu0 %v1778_v18  ;;  %574 = vmatprep.mubr.bf16.mxu1 %v1778_v18  ;;  %v243_v58 = vld [vmem:[#allocation7 + $0xd8] sm:$0xff]  ;;  %v250_v0 = vld [vmem:[#allocation7 + $0x110] sm:$0xff] }
  0x65   :  { %510 = vmatpush1.bf16.msra.mxu0 %v1409_v11  ;;  %551 = vmatpush1.bf16.msra.mxu1 %v1411_v12  ;;  %v1383_v3 = vcombine.low %v1941_v1, %v223_v8  ;;  %v1384_v4 = vcombine.high %v1941_v1, %v223_v8  ;;  %vm497_vm5 = vcmask 654336   ;;  %v1390_v46 = vcombine.high %v226_v39, %v230_v40  ;;  %v254_v1 = vld [vmem:[#allocation7 + $0x130] sm:$0xff]  ;;  %v255_v5 = vld [vmem:[#allocation7 + $0x138] sm:$0xff] }
  0x66   :  { %v98_v9 = vadd.f32 %v97_v14, %v96_v2  ;;  %v108_v10 = vrot.slane %v107_v15, 2  ;;  %v118_v20 = vadd.f32 %v117_v16, %v116_v6  ;;  %v128_v21 = vrot.slane %v127_v17, 4  ;;  %583 = vmatprep.subr.bf16.mxu0 %v1382_v19  ;;  %v251_v2 = vld [vmem:[#allocation7 + $0x118] sm:$0xff]  ;;  %v1586_v14 = vld [vmem:[#allocation8 + $0x40] sm:$0xff]   ;;  %v1591_v19 = vld [vmem:[#allocation8 + $0xc8] sm:$0xff]  }
  0x67   :  { %624 = vmatprep.subr.bf16.mxu1 %v1384_v4  ;;  %v1392_v47 = vcombine.high %v227_v41, %v231_v42  ;;  %v1389_v52 = vcombine.low %v226_v39, %v230_v40  ;;  %v1391_v53 = vcombine.low %v227_v41, %v231_v42  ;;  %v1398_v54 = vcombine.high %v234_v48, %v238_v49  ;;  %v1588_v16 = vld [vmem:[#allocation8] sm:$0xff]   ;;  %v1593_v4 = vld [vmem:[#allocation8 + $0x88] sm:$0xff]   ;;  %v1615_v39 = vld [vmem:[#allocation8 + $0xf8] sm:$0xff]  }
  0x68   :  { %v99_v22 = vrot.slane %v98_v9, 1  ;;  %v109_v23 = vadd.f32 %v108_v10, %v107_v15  ;;  %v119_v24 = vrot.slane %v118_v20, 2  ;;  %v129_v25 = vadd.f32 %v128_v21, %v127_v17  ;;  %v1587_v15 = vld [vmem:[#allocation8 + $0xc0] sm:$0xff]   ;;  %v1595_v10 = vld [vmem:[#allocation8 + $0xd0] sm:$0xff]   ;;  %v1616_v40 = vld [vmem:[#allocation8 + $0x38] sm:$0xff]  }
  0x69   :  { %v1400_v55 = vcombine.high %v235_v50, %v239_v51  ;;  %v1397_v60 = vcombine.low %v234_v48, %v238_v49  ;;  %v1399_v61 = vcombine.low %v235_v50, %v239_v51  ;;  %v1406_v62 = vcombine.high %v242_v56, %v246_v57  ;;  %v1589_v17 = vld [vmem:[#allocation8 + $0x80] sm:$0xff]   ;;  %v1597_v21 = vld [vmem:[#allocation8 + $0x90] sm:$0xff]   ;;  %v1617_v41 = vld [vmem:[#allocation8 + $0xb8] sm:$0xff]  }
  0x6a   :  { %v100_v26 = vadd.f32 %v99_v22, %v98_v9  ;;  %v110_v27 = vrot.slane %v109_v23, 1  ;;  %v120_v28 = vadd.f32 %v119_v24, %v118_v20  ;;  %v130_v29 = vrot.slane %v129_v25, 2  ;;  %v1594_v9 = vld [vmem:[#allocation8 + $0x50] sm:$0xff]   ;;  %v1598_v22 = vld [vmem:[#allocation8 + $0x58] sm:$0xff]   ;;  %v1618_v42 = vld [vmem:[#allocation8 + $0x140] sm:$0xff]  }
  0x6b   :  { %v1408_v63 = vcombine.high %v243_v58, %v247_v59  ;;  %v1405_v6 = vcombine.low %v242_v56, %v246_v57  ;;  %v1407_v7 = vcombine.low %v243_v58, %v247_v59  ;;  %v1414_v8 = vcombine.high %v250_v0, %v254_v1  ;;  %v1596_v20 = vld [vmem:[#allocation8 + $0x10] sm:$0xff]   ;;  %v1600_v24 = vld [vmem:[#allocation8 + $0x18] sm:$0xff]   ;;  %v1969_v48 = vld [vmem:[%s2004_s4] sm:$0xff] }
  0x6c   :  { %v111_v30 = vadd.f32 %v110_v27, %v109_v23  ;;  %v121_v31 = vrot.slane %v120_v28, 1  ;;  %v131_v32 = vadd.f32 %v130_v29, %v129_v25  ;;  %v1416_v11 = vcombine.high %v251_v2, %v255_v5  ;;  %v1599_v23 = vld [vmem:[#allocation8 + $0xd8] sm:$0xff]   ;;  %v1603_v27 = vld [vmem:[#allocation8 + $0xe0] sm:$0xff]  }
  0x6d   :  { %v1413_v12 = vcombine.low %v250_v0, %v254_v1  ;;  %v1601_v25 = vld [vmem:[#allocation8 + $0x98] sm:$0xff]   ;;  %v1605_v29 = vld [vmem:[#allocation8 + $0xa0] sm:$0xff]  }
  0x6e   :  { %v122_v33 = vadd.f32 %v121_v31, %v120_v28  ;;  %v132_v34 = vrot.slane %v131_v32, 1  ;;  %v196_v35 = vsel %vm195_vm2, %v111_v30, %v100_v26  ;;  %v1602_v26 = vld [vmem:[#allocation8 + $0x60] sm:$0xff]   ;;  %v1606_v30 = vld [vmem:[#allocation8 + $0x68] sm:$0xff]  }
  0x6f   :  { %v1604_v28 = vld [vmem:[#allocation8 + $0x20] sm:$0xff]   ;;  %v1607_v31 = vld [vmem:[#allocation8 + $0xe8] sm:$0xff]  }
  0x70   :  { %v133_v36 = vadd.f32 %v132_v34, %v131_v32  ;;  %v198_v37 = vsel %vm197_vm3, %v122_v33, %v196_v35  ;;  %v1608_v32 = vld [vmem:[#allocation8 + $0x28] sm:$0xff]   ;;  %v1610_v34 = vld [vmem:[#allocation8 + $0x70] sm:$0xff]  }
  0x71   :  { %v1609_v33 = vld [vmem:[#allocation8 + $0xa8] sm:$0xff]   ;;  %v1611_v35 = vld [vmem:[#allocation8 + $0xf0] sm:$0xff]  }
  0x72   :  { %v200_v38 = vsel %vm199_vm4, %v133_v36, %v198_v37  ;;  %v1612_v36 = vld [vmem:[#allocation8 + $0x30] sm:$0xff]  }
  0x73   :  { %v1613_v37 = vld [vmem:[#allocation8 + $0xb0] sm:$0xff]  }
  0xd4   :  { %v210_v43 = vpop.permute.xlu0 %209 }
  0xd5   :  { %v212_v44 = vsel %vm89_vm1, %v200_v38, %v210_v43  ;;  %v1614_v38 = vld [vmem:[#allocation8 + $0x78] sm:$0xff]   ;;  %v1619_v43 = vld [vmem:[#allocation8 + $0x1c0] sm:$0xff]  }
  0xd6   :  { %v215_v45 = vpack.c.bf16 %v212_v44, %v212_v44  ;;  %v257_v44 = vlaneseq }
  0xd8   :  { %1417 = vmatmul.mubr.msk.bf16.vlgmr.msra.gmra.mrb[0].mxu0 %vm497_vm5, %v215_v45  ;;  %1418 = vmatmul.mubr.msk.bf16.vlgmr.msra.gmra.mrb[0].mxu1 %vm497_vm5, %v215_v45 }
  0xd9   :  { %584 = vmatpush1.bf16.msra.mxu0 %v1381_v13  ;;  %625 = vmatpush1.bf16.msra.mxu1 %v1383_v3  ;;  %v1415_v13 = vcombine.low %v251_v2, %v255_v5  ;;  %v1592_v3 = vld [vmem:[#allocation8 + $0x8] sm:$0xff]  }
  0xda   :  { %585 = vmatprep.subr.bf16.mxu0 %v1390_v46  ;;  %626 = vmatprep.subr.bf16.mxu1 %v1392_v47 }
  0xdb   :  { %615 = vmatprep.mubr.bf16.mxu0 %v1778_v18  ;;  %656 = vmatprep.mubr.bf16.mxu1 %v1778_v18  ;;  %v1590_v18 = vld [vmem:[#allocation8 + $0x48] sm:$0xff]  }
  0xdd   :  { %586 = vmatpush1.bf16.msra.mxu0 %v1389_v52  ;;  %627 = vmatpush1.bf16.msra.mxu1 %v1391_v53 }
  0xde   :  { %587 = vmatprep.subr.bf16.mxu0 %v1398_v54  ;;  %628 = vmatprep.subr.bf16.mxu1 %v1400_v55 }
  0xe1   :  { %588 = vmatpush1.bf16.msra.mxu0 %v1397_v60  ;;  %629 = vmatpush1.bf16.msra.mxu1 %v1399_v61 }
  0xe2   :  { %589 = vmatprep.subr.bf16.mxu0 %v1406_v62  ;;  %630 = vmatprep.subr.bf16.mxu1 %v1408_v63 }
  0xe5   :  { %590 = vmatpush1.bf16.msra.mxu0 %v1405_v6  ;;  %631 = vmatpush1.bf16.msra.mxu1 %v1407_v7 }
  0xe6   :  { %591 = vmatprep.subr.bf16.mxu0 %v1414_v8  ;;  %632 = vmatprep.subr.bf16.mxu1 %v1416_v11 }
  0xe9   :  { %592 = vmatpush1.bf16.msra.mxu0 %v1413_v12  ;;  %633 = vmatpush1.bf16.msra.mxu1 %v1415_v13  ;;  %v1620_v13 = vld [vmem:[#allocation8 + $0x100] sm:$0xff]  }
  0xea   :  { %1486 = vmatprep.subr.bf16.mxu0 %v1586_v14  ;;  %1508 = vmatprep.subr.bf16.mxu1 %v1587_v15  ;;  %v1621_v14 = vld [vmem:[#allocation8 + $0x180] sm:$0xff]  }
  0xec   :  { %1419 = vmatmul.mubr.msk.bf16.vlgmr.msra.gmra.mrb[4].mxu0 %vm497_vm5, %v215_v45  ;;  %1420 = vmatmul.mubr.msk.bf16.vlgmr.msra.gmra.mrb[4].mxu1 %vm497_vm5, %v215_v45  ;;  %v1962_v45 = vshrl.u32 %v257_v44, 7 }
  0xed   :  { %1487 = vmatpush3.bf16.msra.mxu0 %v1588_v16  ;;  %1509 = vmatpush3.bf16.msra.mxu1 %v1589_v17  ;;  %v1622_v17 = vld [vmem:[#allocation8 + $0x148] sm:$0xff]  }
  0xee   :  { %1488 = vmatprep.subr.bf16.mxu0 %v1590_v18  ;;  %1510 = vmatprep.subr.bf16.mxu1 %v1591_v19  ;;  %v259_v46 = vsub.s32 0, %v1962_v45  ;;  %v267_v47 = vsub.s32 2, %v1962_v45  ;;  %v263_v49 = vsub.s32 1, %v1962_v45  ;;  %v271_v50 = vsub.s32 3, %v1962_v45  ;;  %v1623_v18 = vld [vmem:[#allocation8 + $0x1c8] sm:$0xff]  }
  0xef   :  { %v1624_v19 = vld [vmem:[#allocation8 + $0x108] sm:$0xff]  }
  0xf0   :  { %v260_v51 = vrot.slane %v1969_v48, %v259_v46  ;;  %v268_v52 = vrot.slane %v1969_v48, %v267_v47  ;;  %v264_v53 = vrot.slane %v1969_v48, %v263_v49  ;;  %v272_v54 = vrot.slane %v1969_v48, %v271_v50  ;;  %v1638_v46 = vld [vmem:[#allocation8 + $0x168] sm:$0xff]  }
  0xf1   :  { %1489 = vmatpush3.bf16.msra.mxu0 %v1592_v3  ;;  %1511 = vmatpush3.bf16.msra.mxu1 %v1593_v4  ;;  %v1625_v3 = vld [vmem:[#allocation8 + $0x188] sm:$0xff]   ;;  %v1626_v4 = vld [vmem:[#allocation8 + $0x150] sm:$0xff]  }
  0xf2   :  { %1490 = vmatprep.subr.bf16.mxu0 %v1594_v9  ;;  %1512 = vmatprep.subr.bf16.mxu1 %v1595_v10  ;;  %v1627_v9 = vld [vmem:[#allocation8 + $0x1d0] sm:$0xff]   ;;  %v1639_v47 = vld [vmem:[#allocation8 + $0x1e8] sm:$0xff]  }
  0xf3   :  { %v1628_v10 = vld [vmem:[#allocation8 + $0x110] sm:$0xff]  }
  0xf5   :  { %1491 = vmatpush3.bf16.msra.mxu0 %v1596_v20  ;;  %1513 = vmatpush3.bf16.msra.mxu1 %v1597_v21  ;;  %v1629_v20 = vld [vmem:[#allocation8 + $0x190] sm:$0xff]   ;;  %v279_v21 = vsub.s32 5, %v1962_v45 }
  0xf6   :  { %1492 = vmatprep.subr.bf16.mxu0 %v1598_v22  ;;  %1514 = vmatprep.subr.bf16.mxu1 %v1599_v23  ;;  %v287_v22 = vsub.s32 7, %v1962_v45  ;;  %v1630_v23 = vld [vmem:[#allocation8 + $0x158] sm:$0xff]  }
  0xf9   :  { %1493 = vmatpush3.bf16.msra.mxu0 %v1600_v24  ;;  %1515 = vmatpush3.bf16.msra.mxu1 %v1601_v25  ;;  %v1631_v24 = vld [vmem:[#allocation8 + $0x1d8] sm:$0xff]   ;;  %v280_v25 = vrot.slane %v1969_v48, %v279_v21 }
  0xfa   :  { %1494 = vmatprep.subr.bf16.mxu0 %v1602_v26  ;;  %1516 = vmatprep.subr.bf16.mxu1 %v1603_v27  ;;  %v288_v26 = vrot.slane %v1969_v48, %v287_v22  ;;  %v1632_v27 = vld [vmem:[#allocation8 + $0x118] sm:$0xff]  }
  0xfd   :  { %1495 = vmatpush3.bf16.msra.mxu0 %v1604_v28  ;;  %1517 = vmatpush3.bf16.msra.mxu1 %v1605_v29  ;;  %v1633_v28 = vld [vmem:[#allocation8 + $0x198] sm:$0xff]   ;;  %v1634_v29 = vld [vmem:[#allocation8 + $0x160] sm:$0xff]  }
  0xfe   :  { %1496 = vmatprep.subr.bf16.mxu0 %v1606_v30  ;;  %1518 = vmatprep.subr.bf16.mxu1 %v1607_v31  ;;  %v1635_v30 = vld [vmem:[#allocation8 + $0x1e0] sm:$0xff]  }
 0x101   :  { %1497 = vmatpush3.bf16.msra.mxu0 %v1608_v32  ;;  %1519 = vmatpush3.bf16.msra.mxu1 %v1609_v33 }
 0x102   :  { %1498 = vmatprep.subr.bf16.mxu0 %v1610_v34  ;;  %1520 = vmatprep.subr.bf16.mxu1 %v1611_v35 }
 0x105   :  { %1499 = vmatpush3.bf16.msra.mxu0 %v1612_v36  ;;  %1521 = vmatpush3.bf16.msra.mxu1 %v1613_v37 }
 0x106   :  { %1500 = vmatprep.subr.bf16.mxu0 %v1614_v38  ;;  %1522 = vmatprep.subr.bf16.mxu1 %v1615_v39  ;;  %v1636_v39 = vld [vmem:[#allocation8 + $0x120] sm:$0xff]  }
 0x109   :  { %1501 = vmatpush3.bf16.msra.mxu0 %v1616_v40  ;;  %1523 = vmatpush3.bf16.msra.mxu1 %v1617_v41  ;;  %v1637_v40 = vld [vmem:[#allocation8 + $0x1a0] sm:$0xff]   ;;  %v275_v41 = vsub.s32 4, %v1962_v45 }
 0x10a   :  { %1530 = vmatprep.subr.bf16.mxu0 %v1618_v42  ;;  %1552 = vmatprep.subr.bf16.mxu1 %v1619_v43  ;;  %v283_v42 = vsub.s32 6, %v1962_v45  ;;  %v1642_v45 = vld [vmem:[#allocation8 + $0x170] sm:$0xff]  }
 0x1ab   :  { %v535_v55 = vpop.f32.mrb[0].mxu0  ;;  %v576_v56 = vpop.f32.mrb[0].mxu1 }
 0x1ac   :  { %v536_v57 = vadd.f32 %v535_v55, %v260_v51  ;;  %v577_v58 = vadd.f32 %v576_v56, %v268_v52  ;;  %v537_v59 = vpop.f32.mrb[1].mxu0  ;;  %v578_v60 = vpop.f32.mrb[1].mxu1  ;;  %v276_v55 = vrot.slane %v1969_v48, %v275_v41  ;;  %v284_v56 = vrot.slane %v1969_v48, %v283_v42  ;;  %v1649_v48 = vld [vmem:[#allocation8 + $0x1b8] sm:$0xff]  }
 0x1ad   :  { %v538_v61 = vadd.f32 %v537_v59, %v264_v53  ;;  %v579_v62 = vadd.f32 %v578_v60, %v272_v54  ;;  %v539_v63 = vpop.f32.mrb[2].mxu0  ;;  %v580_v0 = vpop.f32.mrb[2].mxu1  ;;  %v1640_v53 = vld [vmem:[#allocation8 + $0x128] sm:$0xff]   ;;  %v1645_v59 = vld [vmem:[#allocation8 + $0x1b0] sm:$0xff]  }
 0x1ae   :  { %v665_v1 = vmax.f32 %v536_v57, 0.0  ;;  %v667_v2 = vmax.f32 %v577_v58, 0.0  ;;  %v540_v5 = vpop.f32.mrb[3].mxu0  ;;  %v581_v6 = vpop.f32.mrb[3].mxu1  ;;  %v1641_v54 = vld [vmem:[#allocation8 + $0x1a8] sm:$0xff]   ;;  %v1643_v57 = vld [vmem:[#allocation8 + $0x1f0] sm:$0xff]  }
 0x1af   :  { %v666_v7 = vmax.f32 %v538_v61, 0.0  ;;  %v668_v8 = vmax.f32 %v579_v62, 0.0  ;;  %v1644_v58 = vld [vmem:[#allocation8 + $0x130] sm:$0xff]   ;;  %v1646_v62 = vld [vmem:[#allocation8 + $0x178] sm:$0xff]  }
 0x1b0   :  { %v673_v15 = vpack.c.bf16 %v665_v1, %v665_v1  ;;  %v675_v16 = vpack.c.bf16 %v667_v2, %v667_v2  ;;  %v1647_v63 = vld [vmem:[#allocation8 + $0x1f8] sm:$0xff]  }
 0x1b1   :  { %v674_v11 = vpack.c.bf16 %v666_v7, %v666_v7  ;;  %v676_v12 = vpack.c.bf16 %v668_v8, %v668_v8  ;;  %v1648_v0 = vld [vmem:[#allocation8 + $0x138] sm:$0xff]  }
 0x1b3   :  { %1231 = vmatprep.mubr.bf16.mxu0 %v674_v11  ;;  %1271 = vmatprep.mubr.bf16.mxu1 %v676_v12  ;;  %v1421_v11 = vld [vmem:[%s2004_s4 + $0x8] ss:$0 sm:$0xff]  ;;  %s1779_s4 = smov [#allocation10]  }
 0x1b4   :  { %1232 = vmatmul.mubr.bf16.vlgmr.msra.gmra.mrb[8].mxu0 %v673_v15  ;;  %1272 = vmatmul.mubr.bf16.vlgmr.msra.gmra.mrb[8].mxu1 %v675_v16  ;;  %s1366_s22 = sshll.u32 %s1779_s4, 4  ;;  %s1367_s22 = int_to_ptr.vmem [resolvable:$true] %s1366_s22 }
 0x1b5   :  { %1531 = vmatpush3.bf16.msra.mxu0 %v1620_v13  ;;  %1553 = vmatpush3.bf16.msra.mxu1 %v1621_v14  ;;  %s1738_s23 = scalar_lea.vmem %s1367_s22, 64  ;;  %p1743_p5 = scmp.lt.s32.totalorder %s1367_s22, %s1367_s22 }
 0x1b6   :  { %1532 = vmatprep.subr.bf16.mxu0 %v1622_v17  ;;  %1554 = vmatprep.subr.bf16.mxu1 %v1623_v18  ;;  %p1739_p4 = scmp.ne.s32.totalorder %s1367_s22, %s1738_s23  ;;  %p1744_p6 = scmp.lt.s32.totalorder %s1738_s23, %s1738_s23 }
 0x1b8   :  { %p1745_p7 = por %p1744_p6, %p1743_p5 }
 0x1b9   :  { %1533 = vmatpush3.bf16.msra.mxu0 %v1624_v19  ;;  %1555 = vmatpush3.bf16.msra.mxu1 %v1625_v3 }
 0x1ba   :  { %1534 = vmatprep.subr.bf16.mxu0 %v1626_v4  ;;  %1556 = vmatprep.subr.bf16.mxu1 %v1627_v9  ;;  %p1746_p8 = pnand %p1745_p7, %p1739_p4 }
 0x1bd   :  { %1535 = vmatpush3.bf16.msra.mxu0 %v1628_v10  ;;  %1557 = vmatpush3.bf16.msra.mxu1 %v1629_v20 }
 0x1be   :  { %1536 = vmatprep.subr.bf16.mxu0 %v1630_v23  ;;  %1558 = vmatprep.subr.bf16.mxu1 %v1631_v24 }
 0x1bf   :  { %v617_v31 = vpop.f32.mrb[4].mxu0  ;;  %v658_v32 = vpop.f32.mrb[4].mxu1 }
 0x1c0   :  { %v619_v33 = vpop.f32.mrb[5].mxu0  ;;  %v660_v34 = vpop.f32.mrb[5].mxu1  ;;  %v618_v60 = vadd.f32 %v617_v31, %v276_v55  ;;  %v659_v61 = vadd.f32 %v658_v32, %v284_v56 }
 0x1c1   :  { %v620_v35 = vadd.f32 %v619_v33, %v280_v25  ;;  %v661_v36 = vadd.f32 %v660_v34, %v288_v26  ;;  %v621_v37 = vpop.f32.mrb[6].mxu0  ;;  %v662_v38 = vpop.f32.mrb[6].mxu1  ;;  %1537 = vmatpush3.bf16.msra.mxu0 %v1632_v27  ;;  %1559 = vmatpush3.bf16.msra.mxu1 %v1633_v28 }
 0x1c2   :  { %v622_v43 = vpop.f32.mrb[7].mxu0  ;;  %v663_v44 = vpop.f32.mrb[7].mxu1  ;;  %1538 = vmatprep.subr.bf16.mxu0 %v1634_v29  ;;  %1560 = vmatprep.subr.bf16.mxu1 %v1635_v30  ;;  %v669_v1 = vmax.f32 %v618_v60, 0.0  ;;  %v671_v2 = vmax.f32 %v659_v61, 0.0 }
 0x1c3   :  { %v670_v49 = vmax.f32 %v620_v35, 0.0  ;;  %v672_v50 = vmax.f32 %v661_v36, 0.0 }
 0x1c4   :  { %v677_v5 = vpack.c.bf16 %v669_v1, %v669_v1  ;;  %v679_v6 = vpack.c.bf16 %v671_v2, %v671_v2 }
 0x1c5   :  { %v678_v51 = vpack.c.bf16 %v670_v49, %v670_v49  ;;  %v680_v52 = vpack.c.bf16 %v672_v50, %v672_v50  ;;  %1539 = vmatpush3.bf16.msra.mxu0 %v1636_v39  ;;  %1561 = vmatpush3.bf16.msra.mxu1 %v1637_v40 }
 0x1c6   :  { %1540 = vmatprep.subr.bf16.mxu0 %v1638_v46  ;;  %1562 = vmatprep.subr.bf16.mxu1 %v1639_v47 }
 0x1c7   :  { %1311 = vmatprep.mubr.bf16.mxu0 %v678_v51  ;;  %1351 = vmatprep.mubr.bf16.mxu1 %v680_v52 }
 0x1c9   :  { %1541 = vmatpush3.bf16.msra.mxu0 %v1640_v53  ;;  %1563 = vmatpush3.bf16.msra.mxu1 %v1641_v54 }
 0x1ca   :  { %1542 = vmatprep.subr.bf16.mxu0 %v1642_v45  ;;  %1564 = vmatprep.subr.bf16.mxu1 %v1643_v57 }
 0x1cd   :  { %1543 = vmatpush3.bf16.msra.mxu0 %v1644_v58  ;;  %1565 = vmatpush3.bf16.msra.mxu1 %v1645_v59 }
 0x1ce   :  { %1544 = vmatprep.subr.bf16.mxu0 %v1646_v62  ;;  %1566 = vmatprep.subr.bf16.mxu1 %v1647_v63 }
 0x1d1   :  { %1545 = vmatpush3.bf16.msra.mxu0 %v1648_v0  ;;  %1567 = vmatpush3.bf16.msra.mxu1 %v1649_v48 }
 0x1d4   :  { %1312 = vmatmul.mubr.bf16.vlgmr.msra.gmra.mrb[12].mxu0 %v677_v5  ;;  %1352 = vmatmul.mubr.bf16.vlgmr.msra.gmra.mrb[12].mxu1 %v679_v6 }
 0x287   :  { %v1502_v7 = vpop.f32.mrb[8].mxu0  ;;  %v1524_v8 = vpop.f32.mrb[8].mxu1 }
 0x288   :  { %v1503_v12 = vpop.f32.mrb[9].mxu0  ;;  %v1525_v13 = vpop.f32.mrb[9].mxu1 }
 0x289   :  { %v1504_v14 = vadd.f32 %v1503_v12, %v1502_v7  ;;  %v1526_v15 = vadd.f32 %v1525_v13, %v1524_v8  ;;  %v1505_v16 = vpop.f32.mrb[10].mxu0  ;;  %v1527_v17 = vpop.f32.mrb[10].mxu1 }
 0x28a   :  { %v1506_v18 = vpop.f32.mrb[11].mxu0  ;;  %v1528_v19 = vpop.f32.mrb[11].mxu1 }
 0x28b   :  { %v1234_v3 = vadd.f32 %v1504_v14, %v1421_v11 }
 0x28d   :  { %v1274_v4 = vadd.f32 %v1526_v15, %v1234_v3 }
 0x2a7   :  { %v1546_v9 = vpop.f32.mrb[12].mxu0  ;;  %v1568_v10 = vpop.f32.mrb[12].mxu1 }
 0x2a8   :  { %v1547_v20 = vpop.f32.mrb[13].mxu0  ;;  %v1569_v21 = vpop.f32.mrb[13].mxu1 }
 0x2a9   :  { %v1548_v22 = vadd.f32 %v1547_v20, %v1546_v9  ;;  %v1570_v23 = vadd.f32 %v1569_v21, %v1568_v10  ;;  %v1549_v24 = vpop.f32.mrb[14].mxu0  ;;  %v1571_v25 = vpop.f32.mrb[14].mxu1 }
 0x2aa   :  { %v1550_v26 = vpop.f32.mrb[15].mxu0  ;;  %v1572_v27 = vpop.f32.mrb[15].mxu1 }
 0x2ab   :  { %v1314_v28 = vadd.f32 %v1548_v22, %v1274_v4 }
 0x2ad   :  { %v1354_v29 = vadd.f32 %v1570_v23, %v1314_v28 }
 0x2af   :  { %1359 = vst [vmem:[#allocation10] sm:$0xf] %v1354_v29 }
 0x2b0   :  { %1749 = shalt.err (!%p1746_p8)
}
 0x2b1   :  { %s1750_s26 = scalar_lea.hbm %s2005_s5, 64 }
 0x2b2   :  { %p1751_p9 = scmp.ne.s32.totalorder %s2005_s5, %s1750_s26  ;;  %p1754_p10 = scmp.lt.u32.totalorder %s1750_s26, %s2005_s5 }
 0x2b4   :  { %p1756_p11 = pnand %p1754_p10, %p1751_p9 }
 0x2b6   :  { %1759 = shalt.err (!%p1756_p11)
}
 0x2b7   :  { %1369 = dma.vmem_to_hbm [thread:$0]  %s1367_s22, 64, %s2005_s5, [#allocation4]  }
 0x2b8   :  { %1766 = dma.done.wait [#allocation4], 64  }
 0x2b9   :  { %1767 = vsyncadd [#allocation4], 4294967232 }
 0x2ba   :  { %1373 = vsyncpa [#allocation3], 1 }
 0x2bb   :  { %1374 = vsyncpa [#allocation6], 1 }
 0x2bc   :  { %1375 = vsyncpa [#allocation9], 1 }
 0x2bd   :  { %1376 = vsyncpa [#allocation4], 1 }

</bundles_post_ra>
